<compile_context>
chip_gen: v7x
topology: tpu7x:2x2x1
jax: 0.10.0
libtpu: 0.0.40
codegen_flags: <defaults>
</compile_context>

<pallas_src>
import functools

import jax
import jax.numpy as jnp
from jax import lax
from jax.experimental import pallas as pl
from jax.experimental.pallas import tpu as pltpu


def _round_up(x, m):
    return ((x + m - 1) // m) * m


def _choose_tiles(n_pad):
    """n_pad is a multiple of 128. Prefer big tiles; keep >=2 row tiles."""
    def pick(limit):
        for t in (1024, 512, 256, 128):
            if t <= limit and n_pad % t == 0:
                return t
        return 128

    k_tile = pick(n_pad)
    row_limit = max(n_pad // 2, 128)       # >=2 row tiles when possible (v7x: 2 TCs)
    row_tile = pick(min(row_limit, n_pad))
    return row_tile, k_tile


def _vmem_limit(vmem_need):
    # 1 MiB headroom, floor 4 MiB, cap 40 MiB (safe vs v7x's 64 MiB per-TC VMEM).
    return min(max(vmem_need + (1 << 20), 4 << 20), 40 << 20)


# ---------------------------------------------------------------------------
# Stage 1: support = x @ W   (bf16 operands, f32 MXU accumulation, bf16 store)
# ---------------------------------------------------------------------------
def _xw_kernel(x_ref, w_ref, sup_ref):
    sup_ref[...] = jnp.dot(
        x_ref[...], w_ref[...], preferred_element_type=jnp.float32
    ).astype(sup_ref.dtype)


def _compute_support(x_bf, w_bf, *, row_tile):
    n_pad, f_in = x_bf.shape
    f_out = w_bf.shape[1]
    grid = (n_pad // row_tile,)

    vmem_need = (
        2 * row_tile * f_in * 2      # x tile (bf16), double-buffered
        + 2 * f_in * f_out * 2       # weight (bf16, constant block; conservative x2)
        + 2 * row_tile * f_out * 2   # support tile (bf16), double-buffered
    )
    return pl.pallas_call(
        _xw_kernel,
        out_shape=jax.ShapeDtypeStruct((n_pad, f_out), jnp.bfloat16),
        grid_spec=pltpu.PrefetchScalarGridSpec(
            num_scalar_prefetch=0,
            grid=grid,
            in_specs=[
                pl.BlockSpec((row_tile, f_in), lambda i: (i, 0)),
                pl.BlockSpec((f_in, f_out), lambda i: (0, 0)),
            ],
            out_specs=pl.BlockSpec((row_tile, f_out), lambda i: (i, 0)),
        ),
        compiler_params=pltpu.CompilerParams(
            dimension_semantics=("parallel",),
            vmem_limit_bytes=_vmem_limit(vmem_need),
        ),
    )(x_bf, w_bf)


# ---------------------------------------------------------------------------
# Stage 2: out = adj @ support
#   - row tiles "parallel", K tiles "arbitrary"
#   - f32 output block is resident across K; accumulate into it directly
# ---------------------------------------------------------------------------
def _adj_matmul_resident_kernel(adj_ref, sup_ref, out_ref, *, k_tile):
    # support is fully VMEM-resident; slice the K-th strip in-kernel.
    k = pl.program_id(1)

    @pl.when(k == 0)
    def _init():
        out_ref[...] = jnp.zeros_like(out_ref)

    k_off = pl.multiple_of(k * k_tile, k_tile)
    out_ref[...] += jnp.dot(
        adj_ref[...],
        sup_ref[pl.ds(k_off, k_tile), :],
        preferred_element_type=jnp.float32,
    )


def _adj_matmul_tiled_kernel(adj_ref, sup_ref, out_ref):
    k = pl.program_id(1)

    @pl.when(k == 0)
    def _init():
        out_ref[...] = jnp.zeros_like(out_ref)

    out_ref[...] += jnp.dot(
        adj_ref[...], sup_ref[...], preferred_element_type=jnp.float32
    )


def _adj_matmul(adj_bf, support, *, row_tile, k_tile, resident):
    n_pad, f_out = support.shape
    grid = (n_pad // row_tile, n_pad // k_tile)

    adj_spec = pl.BlockSpec((row_tile, k_tile), lambda i, k: (i, k))
    out_spec = pl.BlockSpec((row_tile, f_out), lambda i, k: (i, 0))

    if resident:
        kernel = functools.partial(_adj_matmul_resident_kernel, k_tile=k_tile)
        sup_spec = pl.BlockSpec((n_pad, f_out), lambda i, k: (0, 0))  # fetched once
        sup_bytes = 2 * n_pad * f_out * 2
    else:
        kernel = _adj_matmul_tiled_kernel
        sup_spec = pl.BlockSpec((k_tile, f_out), lambda i, k: (k, 0))
        sup_bytes = 2 * k_tile * f_out * 2

    vmem_need = (
        2 * row_tile * k_tile * 2      # adj tile (bf16), double-buffered
        + sup_bytes                    # support
        + 2 * row_tile * f_out * 4     # f32 output tile (accumulator), double-buffered
    )

    return pl.pallas_call(
        kernel,
        out_shape=jax.ShapeDtypeStruct((n_pad, f_out), jnp.float32),
        grid_spec=pltpu.PrefetchScalarGridSpec(
            num_scalar_prefetch=0,
            grid=grid,
            in_specs=[adj_spec, sup_spec],
            out_specs=out_spec,
        ),
        compiler_params=pltpu.CompilerParams(
            dimension_semantics=("parallel", "arbitrary"),
            vmem_limit_bytes=_vmem_limit(vmem_need),
        ),
    )(adj_bf, support)


# ---------------------------------------------------------------------------
# Public wrapper
# ---------------------------------------------------------------------------
def gcn_conv_dense(x, adj, weight, *, row_tile=None, k_tile=None,
                   support_resident_bytes=8 << 20):
    """output = adj @ (x @ weight); bias/batch_norm disabled (module defaults).

    Intentional precision choice: operands are carried in bf16 (one-time cast
    in the wrapper, amortized across layers/steps), accumulation stays f32.
    """
    # TODO(synk): bias add / BatchNorm1d path not emitted (module defaults disable them).
    # TODO(synk): on v5e an int8 + per-row-scale adj path would further quarter HBM traffic.
    n, f_in = x.shape
    f_out = weight.shape[1]
    assert adj.shape == (n, n)

    n_pad = _round_up(n, 128)
    rt_default, kt_default = _choose_tiles(n_pad)
    row_tile = row_tile or rt_default
    k_tile = k_tile or kt_default
    assert n_pad % row_tile == 0 and n_pad % k_tile == 0

    # One-time casts (halve adj/x HBM bytes; MXU at bf16 rate downstream).
    x_bf = x.astype(jnp.bfloat16)
    w_bf = weight.astype(jnp.bfloat16)
    adj_bf = adj.astype(jnp.bfloat16)

    if n_pad != n:
        pad = n_pad - n
        x_bf = jnp.pad(x_bf, ((0, pad), (0, 0)))
        adj_bf = jnp.pad(adj_bf, ((0, pad), (0, pad)))

    # Stage 1: support = x @ W  (bf16 stored)
    support = _compute_support(x_bf, w_bf, row_tile=row_tile)  # (n_pad, f_out)

    # Stage 2: out = adj @ support (support kept VMEM-resident when it fits)
    resident = (n_pad * f_out * 2) <= support_resident_bytes
    out = _adj_matmul(adj_bf, support, row_tile=row_tile, k_tile=k_tile,
                      resident=resident)
    return out[:n] if n_pad != n else out


def _xavier_uniform(key, fan_in, fan_out, dtype=jnp.float32):
    bound = (6.0 / (fan_in + fan_out)) ** 0.5
    return jax.random.uniform(
        key, (fan_in, fan_out), dtype=dtype, minval=-bound, maxval=bound
    )


if __name__ == "__main__":
    # Small GCN problem. N is deliberately NOT a multiple of 128 to exercise
    # the padding path (no full-extent fallback tiles).
    N, F_IN, F_OUT = 200, 96, 128

    key = jax.random.PRNGKey(0)
    k_w, k_x, k_a = jax.random.split(key, 3)

    # Deterministic parameter init (xavier_uniform, as in the module __init__).
    weight = _xavier_uniform(k_w, F_IN, F_OUT)

    # Inputs: node features and a dense row-normalized adjacency.
    x = jax.random.normal(k_x, (N, F_IN), dtype=jnp.float32)
    adj_raw = jax.random.uniform(k_a, (N, N), dtype=jnp.float32)
    adj = adj_raw / jnp.sum(adj_raw, axis=1, keepdims=True)

    out = gcn_conv_dense(x, adj, weight)
    out = jax.block_until_ready(out)

    # Reference 1: matches the kernel's intentional bf16-operand precision.
    x_b = x.astype(jnp.bfloat16).astype(jnp.float32)
    w_b = weight.astype(jnp.bfloat16).astype(jnp.float32)
    support_b = jnp.dot(
        x_b, w_b, precision=lax.Precision.HIGHEST
    ).astype(jnp.bfloat16).astype(jnp.float32)
    adj_b = adj.astype(jnp.bfloat16).astype(jnp.float32)
    ref_bf16 = jnp.dot(adj_b, support_b, precision=lax.Precision.HIGHEST)

    # Reference 2: full-f32 math (looser tolerance; bf16 quantization is intentional).
    ref_f32 = jnp.dot(
        adj, jnp.dot(x, weight, precision=lax.Precision.HIGHEST),
        precision=lax.Precision.HIGHEST,
    )

    assert out.shape == (N, F_OUT)
    assert jnp.allclose(out, ref_bf16, atol=3e-3, rtol=2e-2), \
        "mismatch vs bf16-consistent reference"
    assert jnp.allclose(out, ref_f32, atol=6e-2, rtol=6e-2), \
        "mismatch vs f32 reference"

    print("KERNEL_OK")
</pallas_src>

<mosaic_0001>
module attributes {stable_mosaic.version = 11 : i64} {
  func.func @_xw_kernel(%arg0: i32, %arg1: memref<128x96xbf16, #tpu.memory_space<vmem>>, %arg2: memref<96x128xbf16, #tpu.memory_space<vmem>>, %arg3: memref<128x128xbf16, #tpu.memory_space<vmem>>) attributes {dimension_semantics = [#tpu.dimension_semantics<parallel>], iteration_bounds = array<i64: 2>, scalar_prefetch = 0 : i64, scratch_operands = 0 : i64, tpu.core_type = #tpu.core_type<tc>, window_params = [{transform_indices = @transform_0, window_bounds = array<i64: 128, 96>}, {pipeline_mode = #tpu.pipeline_mode<synchronous>, transform_indices = @transform_1, window_bounds = array<i64: 96, 128>}, {transform_indices = @transform_2, window_bounds = array<i64: 128, 128>}]} {
    %c0 = arith.constant 0 : index
    %c0_0 = arith.constant 0 : index
    %0 = vector.load %arg1[%c0, %c0_0] : memref<128x96xbf16, #tpu.memory_space<vmem>>, vector<128x96xbf16>
    %c0_1 = arith.constant 0 : index
    %c0_2 = arith.constant 0 : index
    %1 = vector.load %arg2[%c0_1, %c0_2] : memref<96x128xbf16, #tpu.memory_space<vmem>>, vector<96x128xbf16>
    %cst = arith.constant dense<0.000000e+00> : vector<128x128xf32>
    %2 = tpu.matmul %0, %1, %cst {dimension_numbers = #tpu.dot_dimension_numbers<[1], [0], [0], [1], [0, 0, 1, 1], [], []>} : vector<128x96xbf16>, vector<96x128xbf16>, vector<128x128xf32> -> vector<128x128xf32>
    %3 = arith.truncf %2 : vector<128x128xf32> to vector<128x128xbf16>
    %c0_3 = arith.constant 0 : index
    %c0_4 = arith.constant 0 : index
    %4 = vector.load %arg3[%c0_3, %c0_4] : memref<128x128xbf16, #tpu.memory_space<vmem>>, vector<128x128xbf16>
    tpu.vector_store %arg3[%c0_3, %c0_4], %3 {strides = array<i32>} : memref<128x128xbf16, #tpu.memory_space<vmem>>, vector<128x128xbf16>,
    return
  }
  func.func @transform_0(%arg0: i32) -> (i32, i32) {
    %c0_i32 = arith.constant 0 : i32
    %c0_i32_0 = arith.constant 0 : i32
    return %arg0, %c0_i32 : i32, i32
  }
  func.func @transform_1(%arg0: i32) -> (i32, i32) {
    %c0_i32 = arith.constant 0 : i32
    %c0_i32_0 = arith.constant 0 : i32
    %c0_i32_1 = arith.constant 0 : i32
    return %c0_i32, %c0_i32_0 : i32, i32
  }
  func.func @transform_2(%arg0: i32) -> (i32, i32) {
    %c0_i32 = arith.constant 0 : i32
    %c0_i32_0 = arith.constant 0 : i32
    return %arg0, %c0_i32 : i32, i32
  }
}

</mosaic_0001>

<bundles_post_ra>
// kernel: tpu_custom_call.1
= control target key start
LH: loop header
LB: loop body
LE: loop exit
PB: predicated region body
PF: predicated region fallthrough
CT: control target
= control target key end

     0   :  { %7 = vsyncpa [#allocation3], 0  ;;  %s975_s0 = inlined_call_operand.vmem [shape: bf16[256,96], index: 0, kind: input, shape index: {}]   ;;  %s976_s1 = inlined_call_operand.vmem [shape: bf16[96,128], index: 1, kind: input, shape index: {}]   ;;  %s977_s2 = inlined_call_operand.hbm [shape: bf16[256,128], index: 2, kind: output, shape index: {}]  }
   0x1   :  { %9 = vsyncpa [#allocation3 + $0x1], 0  ;;  %s833_s9 = smov 0   ;;  %s835_s10 = smov 0  }
   0x2   :  { %s837_s11 = smov 0   ;;  %s839_s12 = smov 0  }
   0x3 LB: > { %s854_s13 = sadd.s32 4294967295, %s813_s12   ;;  %s528_s14 = sadd.s32 4294967294, %s813_s12   ;;  %s813_s12 = sphi %s839_s12, %s983_s12   ;;  %s809_s11 = sphi %s837_s11, %s982_s11   ;;  %s805_s10 = sphi %s835_s10, %s981_s10   ;;  %s801_s9 = sphi %s833_s9, %s980_s9  }
   0x4   : > { %s858_s15 = sadd.s32 1, %s813_s12   ;;  %s69_s16 = sadd.s32 1, %s809_s11 }
   0x5   : > { %s66_s17 = ssub.s32 %s813_s12, %s858_s15  ;;  %p79_p0 = scmp.ne.s32.totalorder %s809_s11, %s805_s10 }
   0x6   : > { %p67_p1 = scmp.eq.s32.totalorder %s66_s17, 0  ;;  %p80_p2 = scmp.eq.s32.totalorder %s854_s13, 1 }
   0x7   : > { %p85_p3 = scmp.ne.s32.totalorder %s805_s10, %s801_s9  ;;  %p86_p4 = scmp.eq.s32.totalorder %s528_s14, 1 }
   0x8   : > { %s869_s18 = scalar_select %p67_p1, %s809_s11, %s69_s16  }
   0x9   : > { %p871_p5 = por %p80_p2, %p79_p0  ;;  %p875_p6 = por %p86_p4, %p85_p3 }
   0xa   : > { %p531_p7 = scmp.ge.s32.totalorder %s813_s12, 1  ;;  %p116_p8 = scmp.lt.s32.totalorder %s813_s12, 3 }
   0xc   : > { %p117_p9 = pnand %p531_p7, %p116_p8 }
   0xd   : > { %v737_v0 = vld [vmem:[%s976_s1] sm:$0xff] (!%p117_p9)   ;;  %s533_s23 = sshll.u32 (!%p117_p9), %s854_s13, 4  ;;  %v738_v1 = vld [vmem:[%s976_s1 + $0x8] sm:$0xff] (!%p117_p9)   ;;  %v739_v2 = vld [vmem:[%s976_s1 + $0x10] sm:$0xff] (!%p117_p9)   ;;  %vm250_vm0 = vcmask (!%p117_p9), 785408   ;;  %s135_s16 = sand.u32 (!%p117_p9), 1, %s805_s10  }
   0xe   : > { %120 = sbr.rel (%p117_p9) target bundleno = 278 (0x116), region = 28  ;;  %p139_p10 = scmp.lt.s32.totalorder (!%p117_p9), %s533_s23, 31  ;;  %656 = vmatprep.subr.bf16.mxu0 (!%p117_p9), %v737_v0  ;;  %684 = vmatprep.subr.bf16.mxu1 (!%p117_p9), %v737_v0  ;;  %v740_v3 = vld [vmem:[%s976_s1 + $0x18] sm:$0xff] (!%p117_p9)   ;;  %v741_v6 = vld [vmem:[%s976_s1 + $0x20] sm:$0xff] (!%p117_p9)   ;;  %v742_v7 = vld [vmem:[%s976_s1 + $0x28] sm:$0xff] (!%p117_p9)  }
   0xf   : > { %657 = vmatpush3.bf16.msra.mxu0 (!%p117_p9), %v737_v0  ;;  %690 = vmatpush3.bf16.msra.mxu1 (!%p117_p9), %v737_v0  ;;  %s532_s17 = sshll.u32 (!%p117_p9), %s135_s16, 6  ;;  %s594_s22 = sshll.u32 (!%p117_p9), %s854_s13, 10 }
  0x10   : > { %658 = vmatprep.subr.bf16.mxu0 (!%p117_p9), %v738_v1  ;;  %685 = vmatprep.subr.bf16.mxu1 (!%p117_p9), %v738_v1  ;;  %s137_s21 = scalar_lea.vmem (!%p117_p9), [#allocation2], %s532_s17  ;;  %s928_s26 = scalar_lea.hbm (!%p117_p9), %s977_s2, %s594_s22 }
  0x11   : > { %s934_s13 = scalar_lea.sflag (!%p117_p9), [#allocation3], %s135_s16 }
  0x13   : > { %659 = vmatpush3.bf16.msra.mxu0 (!%p117_p9), %v738_v1  ;;  %691 = vmatpush3.bf16.msra.mxu1 (!%p117_p9), %v738_v1 }
  0x14   : > { %660 = vmatprep.subr.bf16.mxu0 (!%p117_p9), %v739_v2  ;;  %686 = vmatprep.subr.bf16.mxu1 (!%p117_p9), %v739_v2 }
  0x15   : > { %s985_s23 = smov (!%p139_p10, %s533_s23), 31 }
  0x16   : > { %s534_s28 = sshll.u32 %s985_s23, 2  ;;  %s466_s23 = sshll.u32 %s137_s21, 4  ;;  %s930_s23 = int_to_ptr.vmem [resolvable:$true] %s466_s23 }
  0x17   : > { %s897_s5 = scalar_lea.vmem %s975_s0, %s534_s28  ;;  %661 = vmatpush3.bf16.msra.mxu0 %v739_v2  ;;  %692 = vmatpush3.bf16.msra.mxu1 %v739_v2  ;;  %s751_s27 = scalar_lea.vmem %s930_s23, 1024 }
  0x18   : > { %v743_v4 = vld [vmem:[%s897_s5] sm:$0xff]   ;;  %662 = vmatprep.subr.bf16.mxu0 %v740_v3  ;;  %687 = vmatprep.subr.bf16.mxu1 %v740_v3  ;;  %v745_v8 = vld [vmem:[%s897_s5 + $0x8] sm:$0xff]   ;;  %v747_v10 = vld [vmem:[%s897_s5 + $0x10] sm:$0xff]   ;;  %p752_p11 = scmp.ne.s32.totalorder %s930_s23, %s751_s27  ;;  %s815_s28 = smov [#allocation2]  }
  0x19   : > { %v744_v5 = vld [vmem:[%s897_s5 + $0x20] sm:$0xff]   ;;  %668 = vmatprep.mubr.msk.bf16.mxu0 %vm250_vm0, %v743_v4  ;;  %v746_v9 = vld [vmem:[%s897_s5 + $0x28] sm:$0xff]   ;;  %v748_v11 = vld [vmem:[%s897_s5 + $0x30] sm:$0xff]   ;;  %s755_s29 = sshll.u32 %s815_s28, 4  ;;  %s756_s29 = int_to_ptr.vmem [resolvable:$false] %s755_s29 }
  0x1a   : > { %676 = vmatprep.mubr.msk.bf16.mxu1 %vm250_vm0, %v744_v5  ;;  %v749_v12 = vld [vmem:[%s897_s5 + $0x18] sm:$0xff]   ;;  %p753_p12 = pnand %p752_p11, %p871_p5  ;;  %s757_s30 = scalar_lea.vmem %s756_s29, 2048 }
  0x1b   : > { %663 = vmatpush3.bf16.msra.mxu0 %v740_v3  ;;  %693 = vmatpush3.bf16.msra.mxu1 %v740_v3  ;;  %v750_v13 = vld [vmem:[%s897_s5 + $0x38] sm:$0xff]   ;;  %p758_p0 = scmp.lt.s32.totalorder %s930_s23, %s756_s29  ;;  %p759_p1 = scmp.lt.s32.totalorder %s757_s30, %s751_s27 }
  0x1c   : > { %664 = vmatprep.subr.bf16.mxu0 %v741_v6  ;;  %688 = vmatprep.subr.bf16.mxu1 %v741_v6  ;;  %p754_p13 = pneg %p753_p12 }
  0x1d   : > { %p760_p2 = por %p759_p1, %p758_p0 }
  0x1f   : > { %665 = vmatpush3.bf16.msra.mxu0 %v741_v6  ;;  %694 = vmatpush3.bf16.msra.mxu1 %v741_v6  ;;  %p761_p3 = pnand %p760_p2, %p754_p13 }
  0x20   : > { %666 = vmatprep.subr.bf16.mxu0 %v742_v7  ;;  %689 = vmatprep.subr.bf16.mxu1 %v742_v7 }
  0x23   : > { %667 = vmatpush3.bf16.msra.mxu0 %v742_v7  ;;  %695 = vmatpush3.bf16.msra.mxu1 %v742_v7 }
  0x26   : > { %669 = vmatmul.mubr.msk.bf16.vlgmr.msra.gmra.mrb[0].mxu0 %vm250_vm0, %v745_v8  ;;  %677 = vmatmul.mubr.msk.bf16.vlgmr.msra.gmra.mrb[0].mxu1 %vm250_vm0, %v746_v9 }
  0x27   : > { %672 = vmatprep.mubr.msk.bf16.mxu0 %vm250_vm0, %v747_v10  ;;  %680 = vmatprep.mubr.msk.bf16.mxu1 %vm250_vm0, %v748_v11 }
  0x2e   : > { %673 = vmatmul.mubr.msk.bf16.gmra.mrb[4].mxu0 %vm250_vm0, %v749_v12  ;;  %681 = vmatmul.mubr.msk.bf16.gmra.mrb[4].mxu1 %vm250_vm0, %v750_v13 }
  0xf9   : > { %v670_v14 = vpop.f32.mrb[0].mxu0  ;;  %v678_v15 = vpop.f32.mrb[0].mxu1 }
  0xfa   : > { %v309_v16 = vpop.f32.mrb[1].mxu0  ;;  %v341_v17 = vpop.f32.mrb[1].mxu1 }
  0xfb   : > { %v671_v18 = vpop.f32.mrb[2].mxu0  ;;  %v679_v19 = vpop.f32.mrb[2].mxu1 }
  0xfc   : > { %v603_v20 = vpack.c.bf16 %v671_v18, %v670_v14  ;;  %v623_v21 = vpack.c.bf16 %v679_v19, %v678_v15  ;;  %v312_v22 = vpop.f32.mrb[3].mxu0  ;;  %v344_v23 = vpop.f32.mrb[3].mxu1 }
  0xfd   : > { %v598_v24 = vpack.c.bf16 %v312_v22, %v309_v16  ;;  %v618_v25 = vpack.c.bf16 %v344_v23, %v341_v17 }
  0xfe   : > { %635 = vst [vmem:[%s137_s21 + $0x8] sm:$0xff] %v603_v20   ;;  %639 = vst [vmem:[%s137_s21 + $0x28] sm:$0xff] %v623_v21  }
  0xff   : > { %599 = vst [vmem:[%s137_s21] sm:$0xff] %v598_v24   ;;  %638 = vst [vmem:[%s137_s21 + $0x20] sm:$0xff] %v618_v25  }
 0x101   : > { %v674_v26 = vpop.f32.mrb[4].mxu0  ;;  %v682_v27 = vpop.f32.mrb[4].mxu1 }
 0x102   : > { %v325_v28 = vpop.f32.mrb[5].mxu0  ;;  %v357_v29 = vpop.f32.mrb[5].mxu1 }
 0x103   : > { %v675_v30 = vpop.f32.mrb[6].mxu0  ;;  %v683_v31 = vpop.f32.mrb[6].mxu1 }
 0x104   : > { %v613_v32 = vpack.c.bf16 %v675_v30, %v674_v26  ;;  %v633_v33 = vpack.c.bf16 %v683_v31, %v682_v27  ;;  %v328_v34 = vpop.f32.mrb[7].mxu0  ;;  %v360_v35 = vpop.f32.mrb[7].mxu1 }
 0x105   : > { %v608_v36 = vpack.c.bf16 %v328_v34, %v325_v28  ;;  %v628_v37 = vpack.c.bf16 %v360_v35, %v357_v29 }
 0x106   : > { %637 = vst [vmem:[%s137_s21 + $0x18] sm:$0xff] %v613_v32   ;;  %641 = vst [vmem:[%s137_s21 + $0x38] sm:$0xff] %v633_v33  }
 0x107   : > { %636 = vst [vmem:[%s137_s21 + $0x10] sm:$0xff] %v608_v36   ;;  %640 = vst [vmem:[%s137_s21 + $0x30] sm:$0xff] %v628_v37  }
 0x108   : > { %764 = shalt.err (!%p761_p3)
}
 0x109   : > { %s765_s3 = scalar_lea.hbm %s928_s26, 1024  ;;  %s769_s6 = scalar_lea.hbm %s977_s2, 2048 }
 0x10a   : > { %p766_p4 = scmp.ne.s32.totalorder %s928_s26, %s765_s3  ;;  %p770_p9 = scmp.lt.u32.totalorder %s928_s26, %s977_s2 }
 0x10b   : > { %p771_p10 = scmp.lt.u32.totalorder %s769_s6, %s765_s3  ;;  %p773_p12 = scmp.lt.u32.totalorder %s765_s3, %s928_s26 }
 0x10c   : > { %p767_p7 = pnand %p766_p4, %p871_p5 }
 0x10d   : > { %p772_p11 = por %p771_p10, %p770_p9 }
 0x10e   : > { %p768_p8 = pneg %p767_p7 }
 0x10f   : > { %p774_p13 = por %p773_p12, %p772_p11 }
 0x111   : > { %p775_p0 = pnand %p774_p13, %p768_p8 }
 0x113   : > { %778 = shalt.err (!%p775_p0)
}
 0x114   : > { %s816_s14 = smov 64   ;;  %s817_s16 = smov 4  }
 0x115   : > { %696 = dma.vmem_to_hbm [thread:$0]  (%p871_p5), %s930_s23, 1024, %s928_s26, %s934_s13, %s816_s14, %s816_s14, %s817_s16  }
 0x116 PF: > { %p702_p1 = scmp.ge.s32.totalorder %s813_s12, 2  ;;  %s481_s17 = sand.u32 1, %s801_s9  }
 0x117   : > { %s482_s21 = scalar_lea.sflag [#allocation3], %s481_s17 }
 0x118   : > { %p699_p2 = pnand %p702_p1, %p875_p6 }
 0x11a   : > { %796 = dma.done.wait (!%p699_p2), %s482_s21, 1024  }
 0x11b   : > { %798 = vsyncadd (!%p699_p2), %s482_s21, 4294966272  ;;  %p12_p3 = scmp.ge.s32.totalorder %s858_s15, 4   ;;  %s980_s9 = smov %s805_s10 }
 0x11c   : > { %s981_s10 = smov %s809_s11  ;;  %s982_s11 = smov %s869_s18 }
 0x11d   : > { %s983_s12 = smov %s858_s15  ;;  %14 = sbr.rel (!%p12_p3) target bundleno = 3 (0x3), region = 63 }
 0x124   :  { %487 = vsyncpa [#allocation3], 1 }
 0x125   :  { %489 = vsyncpa [#allocation3 + $0x1], 1 }

</bundles_post_ra>
